<compile_context>
chip_gen: v6e
topology: v6e:2x2x1
jax: 0.10.0
libtpu: 0.0.40
codegen_flags: <defaults>
</compile_context>

<pallas_src>
import jax
import jax.numpy as jnp
from jax import lax
from jax.experimental import pallas as pl
from jax.experimental.pallas import tpu as pltpu

# ----- Hyperparameters (small, consistent with the module) -----
B = 2              # batch
T = 8              # sequence length (block_size)
D = 32             # num_dim (embedding dim)
NUM_HEADS = 4
HEAD = D // NUM_HEADS      # head_size = 8
HIDDEN = 4 * D             # feed-forward hidden = 128
LN_EPS = 1e-5              # PyTorch nn.LayerNorm default
BT = B * T                 # batch folded into rows

# ----- packed f32 slab layout (rows) -----
(_ROW_LN1_G, _ROW_LN1_B, _ROW_BO, _ROW_LN2_G,
 _ROW_LN2_B, _ROW_B2, _ROW_B1) = range(7)
_ROW_BIAS = 8                      # rows 8 .. 8+BT hold the attention bias
P_ROWS = _ROW_BIAS + BT            # 24
P_LANES = HIDDEN                   # 128

# ----- packed bf16 weight slab layout -----
W_ROWS = D + HIDDEN                # 160  (rows 0:32 = D-row weights, 32:160 = w2)
W_LANES = 4 * D + HIDDEN           # 256  (lanes: [wqkv | wo | w1])


def _layernorm(h, gamma, beta):
    mu = jnp.mean(h, axis=-1, keepdims=True)
    var = jnp.mean((h - mu) * (h - mu), axis=-1, keepdims=True)
    return (h - mu) * lax.rsqrt(var + LN_EPS) * gamma + beta


def block_kernel(x_ref, p_ref, w_ref, o_ref):
    x = x_ref[...]                                           # (BT, D) f32

    # ---- unpack the two parameter slabs (static slices) ----
    ln1_g = p_ref[_ROW_LN1_G:_ROW_LN1_G + 1, 0:D]
    ln1_b = p_ref[_ROW_LN1_B:_ROW_LN1_B + 1, 0:D]
    bo    = p_ref[_ROW_BO:_ROW_BO + 1, 0:D]
    ln2_g = p_ref[_ROW_LN2_G:_ROW_LN2_G + 1, 0:D]
    ln2_b = p_ref[_ROW_LN2_B:_ROW_LN2_B + 1, 0:D]
    b2    = p_ref[_ROW_B2:_ROW_B2 + 1, 0:D]
    b1    = p_ref[_ROW_B1:_ROW_B1 + 1, 0:HIDDEN]
    bias  = p_ref[_ROW_BIAS:_ROW_BIAS + BT, 0:BT]            # (BT, BT) mask bias

    wqkv = w_ref[0:D, 0:3 * D]                               # (D, 3D) bf16 (Q cols pre-scaled)
    wo   = w_ref[0:D, 3 * D:4 * D]                           # (D, D)   bf16
    w1   = w_ref[0:D, 4 * D:4 * D + HIDDEN]                  # (D, HIDDEN) bf16
    w2   = w_ref[D:D + HIDDEN, 0:D]                          # (HIDDEN, D) bf16

    # ---- ln1 (f32) + multi-head causal self-attention ----
    h1 = _layernorm(x, ln1_g, ln1_b)                         # (BT, D) f32
    qkv = jnp.dot(h1.astype(jnp.bfloat16), wqkv,
                  preferred_element_type=jnp.float32)        # (BT, 3D): one MXU push
    q = qkv[:, 0:D].astype(jnp.bfloat16)
    k = qkv[:, D:2 * D].astype(jnp.bfloat16)
    v = qkv[:, 2 * D:3 * D].astype(jnp.bfloat16)

    ctx_heads = []
    for h in range(NUM_HEADS):                               # static unroll, 4 heads
        sl = slice(h * HEAD, (h + 1) * HEAD)
        s = jnp.einsum('qd,kd->qk', q[:, sl], k[:, sl],
                       preferred_element_type=jnp.float32)   # (BT, BT), scale pre-folded
        s = s + bias                                         # block-diag + causal
        s = s - jnp.max(s, axis=-1, keepdims=True)
        p = jnp.exp(s)
        p = p * pl.reciprocal(jnp.sum(p, axis=-1, keepdims=True), approx=True)
        ctx_heads.append(jnp.dot(p.astype(jnp.bfloat16), v[:, sl],
                                 preferred_element_type=jnp.float32))
    ctx = jnp.concatenate(ctx_heads, axis=-1)                # (BT, D) lane concat (XLU)

    sa = jnp.dot(ctx.astype(jnp.bfloat16), wo,
                 preferred_element_type=jnp.float32) + bo    # single output projection
    x1 = x + sa                                              # residual 1

    # ---- ln2 (f32) + feed-forward (Linear -> ReLU -> Linear) ----
    h2 = _layernorm(x1, ln2_g, ln2_b)
    f = jnp.dot(h2.astype(jnp.bfloat16), w1,
                preferred_element_type=jnp.float32) + b1
    f = jnp.maximum(f, 0.0)
    f = jnp.dot(f.astype(jnp.bfloat16), w2,
                preferred_element_type=jnp.float32) + b2
    # TODO(synk): dropout layers are identity in eval mode; not implemented.

    o_ref[...] = x1 + f                                      # residual 2


def transformer_block(x, params):
    (ln1_g, ln1_b, wq, wk, wv, wo, bo, ln2_g, ln2_b, w1, b1, w2, b2) = params
    scale = float(HEAD) ** -0.5

    # ---- f32 slab: LN params, biases, and precomputed attention mask bias ----
    row = jnp.arange(BT)[:, None]
    col = jnp.arange(BT)[None, :]
    allowed = (row // T == col // T) & (col <= row)          # block-diag & causal
    bias = jnp.where(allowed, 0.0, -1e30).astype(jnp.float32)

    p_slab = jnp.zeros((P_ROWS, P_LANES), jnp.float32)
    small = jnp.concatenate([ln1_g, ln1_b, bo, ln2_g, ln2_b, b2], axis=0)  # (6, D)
    p_slab = p_slab.at[0:6, 0:D].set(small)
    p_slab = p_slab.at[_ROW_B1, 0:HIDDEN].set(b1.reshape(HIDDEN))
    p_slab = p_slab.at[_ROW_BIAS:_ROW_BIAS + BT, 0:BT].set(bias)

    # ---- bf16 slab: all matmul weights, QKV fused, 1/sqrt(head) folded into Q ----
    wqkv = jnp.concatenate([wq * scale, wk, wv], axis=1)     # (D, 3D)
    top = jnp.concatenate([wqkv, wo, w1], axis=1)            # (D, 4D + HIDDEN) = (32, 256)
    w_slab = jnp.zeros((W_ROWS, W_LANES), jnp.bfloat16)
    w_slab = w_slab.at[0:D, :].set(top.astype(jnp.bfloat16))
    w_slab = w_slab.at[D:D + HIDDEN, 0:D].set(w2.astype(jnp.bfloat16))

    # Everything (~100 KB) lives whole in VMEM: no grid, 3 input DMAs total.
    out = pl.pallas_call(
        block_kernel,
        out_shape=jax.ShapeDtypeStruct((BT, D), jnp.float32),
        in_specs=[pl.BlockSpec(memory_space=pltpu.MemorySpace.VMEM)] * 3,
        out_specs=pl.BlockSpec(memory_space=pltpu.MemorySpace.VMEM),
    )(x.reshape(BT, D), p_slab, w_slab)
    return out.reshape(B, T, D)


# ----- pure-JAX reference for validation -----
def reference_block(x, params):
    (ln1_g, ln1_b, wq, wk, wv, wo, bo, ln2_g, ln2_b, w1, b1, w2, b2) = params

    def ln(h, g, bta):
        mu = jnp.mean(h, axis=-1, keepdims=True)
        var = jnp.mean((h - mu) ** 2, axis=-1, keepdims=True)
        return (h - mu) / jnp.sqrt(var + LN_EPS) * g + bta

    h1 = ln(x, ln1_g, ln1_b)
    q = h1 @ wq
    k = h1 @ wk
    v = h1 @ wv
    q = q.reshape(B, T, NUM_HEADS, HEAD).transpose(0, 2, 1, 3)
    k = k.reshape(B, T, NUM_HEADS, HEAD).transpose(0, 2, 1, 3)
    v = v.reshape(B, T, NUM_HEADS, HEAD).transpose(0, 2, 1, 3)
    s = jnp.einsum("bhqd,bhkd->bhqk", q, k) * (HEAD ** -0.5)
    mask = jnp.tril(jnp.ones((T, T), bool))
    s = jnp.where(mask, s, -jnp.inf)
    p = jax.nn.softmax(s, axis=-1)
    o = jnp.einsum("bhqk,bhkd->bhqd", p, v).transpose(0, 2, 1, 3).reshape(B, T, D)
    x1 = x + (o @ wo + bo)
    h2 = ln(x1, ln2_g, ln2_b)
    f = jnp.maximum(h2 @ w1 + b1, 0.0) @ w2 + b2
    return x1 + f


def make_params(key):
    ks = jax.random.split(key, 8)
    std = 0.02
    ln1_g = jnp.ones((1, D), jnp.float32)
    ln1_b = jnp.zeros((1, D), jnp.float32)
    wq = (jax.random.normal(ks[0], (D, D)) * std).astype(jnp.float32)
    wk = (jax.random.normal(ks[1], (D, D)) * std).astype(jnp.float32)
    wv = (jax.random.normal(ks[2], (D, D)) * std).astype(jnp.float32)
    wo = (jax.random.normal(ks[3], (D, D)) * std).astype(jnp.float32)
    bo = jnp.zeros((1, D), jnp.float32)
    ln2_g = jnp.ones((1, D), jnp.float32)
    ln2_b = jnp.zeros((1, D), jnp.float32)
    w1 = (jax.random.normal(ks[4], (D, HIDDEN)) * std).astype(jnp.float32)
    b1 = jnp.zeros((1, HIDDEN), jnp.float32)
    w2 = (jax.random.normal(ks[5], (HIDDEN, D)) * std).astype(jnp.float32)
    b2 = jnp.zeros((1, D), jnp.float32)
    return (ln1_g, ln1_b, wq, wk, wv, wo, bo, ln2_g, ln2_b, w1, b1, w2, b2)


if __name__ == "__main__":
    key = jax.random.PRNGKey(0)
    kx, kp = jax.random.split(key)
    x = jax.random.normal(kx, (B, T, D), dtype=jnp.float32)
    params = make_params(kp)

    out = jax.block_until_ready(transformer_block(x, params))
    ref = reference_block(x, params)
    assert out.shape == (B, T, D)
    # bf16 MXU operands (f32 accumulation) vs the f32 reference -> loosened tol.
    max_err = jnp.max(jnp.abs(out - ref))
    assert jnp.allclose(out, ref, rtol=2e-2, atol=2e-2), (
        f"mismatch vs reference (max abs err {max_err})")
    print("KERNEL_OK")
</pallas_src>

<mosaic_0001>
module attributes {stable_mosaic.version = 11 : i64} {
  func.func @block_kernel(%arg0: memref<16x32xf32, #tpu.memory_space<vmem>>, %arg1: memref<24x128xf32, #tpu.memory_space<vmem>>, %arg2: memref<160x256xbf16, #tpu.memory_space<vmem>>, %arg3: memref<16x32xf32, #tpu.memory_space<vmem>>) attributes {dimension_semantics = [], scalar_prefetch = 0 : i64, scratch_operands = 0 : i64, tpu.core_type = #tpu.core_type<tc>} {
    %c0 = arith.constant 0 : index
    %c0_0 = arith.constant 0 : index
    %0 = vector.load %arg0[%c0, %c0_0] : memref<16x32xf32, #tpu.memory_space<vmem>>, vector<16x32xf32>
    %c0_1 = arith.constant 0 : index
    %c0_2 = arith.constant 0 : index
    %1 = vector.load %arg1[%c0_1, %c0_2] : memref<24x128xf32, #tpu.memory_space<vmem>>, vector<1x32xf32>
    %c1 = arith.constant 1 : index
    %c0_3 = arith.constant 0 : index
    %2 = vector.load %arg1[%c1, %c0_3] : memref<24x128xf32, #tpu.memory_space<vmem>>, vector<1x32xf32>
    %c2 = arith.constant 2 : index
    %c0_4 = arith.constant 0 : index
    %3 = vector.load %arg1[%c2, %c0_4] : memref<24x128xf32, #tpu.memory_space<vmem>>, vector<1x32xf32>
    %c3 = arith.constant 3 : index
    %c0_5 = arith.constant 0 : index
    %4 = vector.load %arg1[%c3, %c0_5] : memref<24x128xf32, #tpu.memory_space<vmem>>, vector<1x32xf32>
    %c4 = arith.constant 4 : index
    %c0_6 = arith.constant 0 : index
    %5 = vector.load %arg1[%c4, %c0_6] : memref<24x128xf32, #tpu.memory_space<vmem>>, vector<1x32xf32>
    %c5 = arith.constant 5 : index
    %c0_7 = arith.constant 0 : index
    %6 = vector.load %arg1[%c5, %c0_7] : memref<24x128xf32, #tpu.memory_space<vmem>>, vector<1x32xf32>
    %c6 = arith.constant 6 : index
    %c0_8 = arith.constant 0 : index
    %7 = vector.load %arg1[%c6, %c0_8] : memref<24x128xf32, #tpu.memory_space<vmem>>, vector<1x128xf32>
    %c8 = arith.constant 8 : index
    %c0_9 = arith.constant 0 : index
    %8 = vector.load %arg1[%c8, %c0_9] : memref<24x128xf32, #tpu.memory_space<vmem>>, vector<16x16xf32>
    %c0_10 = arith.constant 0 : index
    %c0_11 = arith.constant 0 : index
    %9 = vector.load %arg2[%c0_10, %c0_11] : memref<160x256xbf16, #tpu.memory_space<vmem>>, vector<32x96xbf16>
    %c0_12 = arith.constant 0 : index
    %c96 = arith.constant 96 : index
    %10 = vector.load %arg2[%c0_12, %c96] : memref<160x256xbf16, #tpu.memory_space<vmem>>, vector<32x32xbf16>
    %c0_13 = arith.constant 0 : index
    %c128 = arith.constant 128 : index
    %11 = vector.load %arg2[%c0_13, %c128] : memref<160x256xbf16, #tpu.memory_space<vmem>>, vector<32x128xbf16>
    %c32 = arith.constant 32 : index
    %c0_14 = arith.constant 0 : index
    %12 = vector.load %arg2[%c32, %c0_14] : memref<160x256xbf16, #tpu.memory_space<vmem>>, vector<128x32xbf16>
    %cst = arith.constant dense<0.000000e+00> : vector<16xf32>
    %13 = vector.multi_reduction <add>, %0, %cst [1] : vector<16x32xf32> to vector<16xf32>
    %14 = vector.shape_cast %13 : vector<16xf32> to vector<16x1xf32>
    %cst_15 = arith.constant 3.200000e+01 : f32
    %15 = vector.broadcast %cst_15 : f32 to vector<16x1xf32>
    %16 = arith.divf %14, %15 : vector<16x1xf32>
    %17 = vector.broadcast %16 : vector<16x1xf32> to vector<16x32xf32>
    %18 = arith.subf %0, %17 : vector<16x32xf32>
    %19 = vector.broadcast %16 : vector<16x1xf32> to vector<16x32xf32>
    %20 = arith.subf %0, %19 : vector<16x32xf32>
    %21 = arith.mulf %18, %20 : vector<16x32xf32>
    %cst_16 = arith.constant dense<0.000000e+00> : vector<16xf32>
    %22 = vector.multi_reduction <add>, %21, %cst_16 [1] : vector<16x32xf32> to vector<16xf32>
    %23 = vector.shape_cast %22 : vector<16xf32> to vector<16x1xf32>
    %cst_17 = arith.constant 3.200000e+01 : f32
    %24 = vector.broadcast %cst_17 : f32 to vector<16x1xf32>
    %25 = arith.divf %23, %24 : vector<16x1xf32>
    %26 = vector.broadcast %16 : vector<16x1xf32> to vector<16x32xf32>
    %27 = arith.subf %0, %26 : vector<16x32xf32>
    %cst_18 = arith.constant 9.99999974E-6 : f32
    %28 = vector.broadcast %cst_18 : f32 to vector<16x1xf32>
    %29 = arith.addf %25, %28 : vector<16x1xf32>
    %30 = math.rsqrt %29 : vector<16x1xf32>
    %31 = vector.broadcast %30 : vector<16x1xf32> to vector<16x32xf32>
    %32 = arith.mulf %27, %31 : vector<16x32xf32>
    %33 = vector.broadcast %1 : vector<1x32xf32> to vector<16x32xf32>
    %34 = arith.mulf %32, %33 : vector<16x32xf32>
    %35 = vector.broadcast %2 : vector<1x32xf32> to vector<16x32xf32>
    %36 = arith.addf %34, %35 : vector<16x32xf32>
    %37 = arith.truncf %36 : vector<16x32xf32> to vector<16x32xbf16>
    %cst_19 = arith.constant dense<0.000000e+00> : vector<16x96xf32>
    %38 = tpu.matmul %37, %9, %cst_19 {dimension_numbers = #tpu.dot_dimension_numbers<[1], [0], [0], [1], [0, 0, 1, 1], [], []>} : vector<16x32xbf16>, vector<32x96xbf16>, vector<16x96xf32> -> vector<16x96xf32>
    %39 = vector.extract_strided_slice %38 {offsets = [0, 0], sizes = [16, 32], strides = [1, 1]} : vector<16x96xf32> to vector<16x32xf32>
    %40 = arith.truncf %39 : vector<16x32xf32> to vector<16x32xbf16>
    %41 = vector.extract_strided_slice %38 {offsets = [0, 32], sizes = [16, 32], strides = [1, 1]} : vector<16x96xf32> to vector<16x32xf32>
    %42 = arith.truncf %41 : vector<16x32xf32> to vector<16x32xbf16>
    %43 = vector.extract_strided_slice %38 {offsets = [0, 64], sizes = [16, 32], strides = [1, 1]} : vector<16x96xf32> to vector<16x32xf32>
    %44 = arith.truncf %43 : vector<16x32xf32> to vector<16x32xbf16>
    %45 = vector.extract_strided_slice %40 {offsets = [0, 0], sizes = [16, 8], strides = [1, 1]} : vector<16x32xbf16> to vector<16x8xbf16>
    %46 = vector.extract_strided_slice %42 {offsets = [0, 0], sizes = [16, 8], strides = [1, 1]} : vector<16x32xbf16> to vector<16x8xbf16>
    "tpu.trace_start"() <{level = 10 : i32, message = "qd,kd->qk"}> : () -> ()
    %cst_20 = arith.constant dense<0.000000e+00> : vector<16x16xf32>
    %47 = tpu.matmul %45, %46, %cst_20 {dimension_numbers = #tpu.dot_dimension_numbers<[1], [1], [0], [0], [0, 0, 1, 0], [], []>} : vector<16x8xbf16>, vector<16x8xbf16>, vector<16x16xf32> -> vector<16x16xf32>
    "tpu.trace_stop"() : () -> ()
    %48 = arith.addf %47, %8 : vector<16x16xf32>
    %cst_21 = arith.constant dense<0xFF800000> : vector<16xf32>
    %49 = vector.multi_reduction <maximumf>, %48, %cst_21 [1] : vector<16x16xf32> to vector<16xf32>
    %50 = vector.shape_cast %49 : vector<16xf32> to vector<16x1xf32>
    %51 = vector.broadcast %50 : vector<16x1xf32> to vector<16x16xf32>
    %52 = arith.subf %48, %51 : vector<16x16xf32>
    %53 = math.exp %52 : vector<16x16xf32>
    %cst_22 = arith.constant dense<0.000000e+00> : vector<16xf32>
    %54 = vector.multi_reduction <add>, %53, %cst_22 [1] : vector<16x16xf32> to vector<16xf32>
    %55 = vector.shape_cast %54 : vector<16xf32> to vector<16x1xf32>
    %56 = tpu.reciprocal %55 {approx = true} : vector<16x1xf32> -> vector<16x1xf32>
    %57 = vector.broadcast %56 : vector<16x1xf32> to vector<16x16xf32>
    %58 = arith.mulf %53, %57 : vector<16x16xf32>
    %59 = arith.truncf %58 : vector<16x16xf32> to vector<16x16xbf16>
    %60 = vector.extract_strided_slice %44 {offsets = [0, 0], sizes = [16, 8], strides = [1, 1]} : vector<16x32xbf16> to vector<16x8xbf16>
    %cst_23 = arith.constant dense<0.000000e+00> : vector<16x8xf32>
    %61 = tpu.matmul %59, %60, %cst_23 {dimension_numbers = #tpu.dot_dimension_numbers<[1], [0], [0], [1], [0, 0, 1, 1], [], []>} : vector<16x16xbf16>, vector<16x8xbf16>, vector<16x8xf32> -> vector<16x8xf32>
    %62 = vector.extract_strided_slice %40 {offsets = [0, 8], sizes = [16, 8], strides = [1, 1]} : vector<16x32xbf16> to vector<16x8xbf16>
    %63 = vector.extract_strided_slice %42 {offsets = [0, 8], sizes = [16, 8], strides = [1, 1]} : vector<16x32xbf16> to vector<16x8xbf16>
    "tpu.trace_start"() <{level = 10 : i32, message = "qd,kd->qk"}> : () -> ()
    %cst_24 = arith.constant dense<0.000000e+00> : vector<16x16xf32>
    %64 = tpu.matmul %62, %63, %cst_24 {dimension_numbers = #tpu.dot_dimension_numbers<[1], [1], [0], [0], [0, 0, 1, 0], [], []>} : vector<16x8xbf16>, vector<16x8xbf16>, vector<16x16xf32> -> vector<16x16xf32>
    "tpu.trace_stop"() : () -> ()
    %65 = arith.addf %64, %8 : vector<16x16xf32>
    %cst_25 = arith.constant dense<0xFF800000> : vector<16xf32>
    %66 = vector.multi_reduction <maximumf>, %65, %cst_25 [1] : vector<16x16xf32> to vector<16xf32>
    %67 = vector.shape_cast %66 : vector<16xf32> to vector<16x1xf32>
    %68 = vector.broadcast %67 : vector<16x1xf32> to vector<16x16xf32>
    %69 = arith.subf %65, %68 : vector<16x16xf32>
    %70 = math.exp %69 : vector<16x16xf32>
    %cst_26 = arith.constant dense<0.000000e+00> : vector<16xf32>
    %71 = vector.multi_reduction <add>, %70, %cst_26 [1] : vector<16x16xf32> to vector<16xf32>
    %72 = vector.shape_cast %71 : vector<16xf32> to vector<16x1xf32>
    %73 = tpu.reciprocal %72 {approx = true} : vector<16x1xf32> -> vector<16x1xf32>
    %74 = vector.broadcast %73 : vector<16x1xf32> to vector<16x16xf32>
    %75 = arith.mulf %70, %74 : vector<16x16xf32>
    %76 = arith.truncf %75 : vector<16x16xf32> to vector<16x16xbf16>
    %77 = vector.extract_strided_slice %44 {offsets = [0, 8], sizes = [16, 8], strides = [1, 1]} : vector<16x32xbf16> to vector<16x8xbf16>
    %cst_27 = arith.constant dense<0.000000e+00> : vector<16x8xf32>
    %78 = tpu.matmul %76, %77, %cst_27 {dimension_numbers = #tpu.dot_dimension_numbers<[1], [0], [0], [1], [0, 0, 1, 1], [], []>} : vector<16x16xbf16>, vector<16x8xbf16>, vector<16x8xf32> -> vector<16x8xf32>
    %79 = vector.extract_strided_slice %40 {offsets = [0, 16], sizes = [16, 8], strides = [1, 1]} : vector<16x32xbf16> to vector<16x8xbf16>
    %80 = vector.extract_strided_slice %42 {offsets = [0, 16], sizes = [16, 8], strides = [1, 1]} : vector<16x32xbf16> to vector<16x8xbf16>
    "tpu.trace_start"() <{level = 10 : i32, message = "qd,kd->qk"}> : () -> ()
    %cst_28 = arith.constant dense<0.000000e+00> : vector<16x16xf32>
    %81 = tpu.matmul %79, %80, %cst_28 {dimension_numbers = #tpu.dot_dimension_numbers<[1], [1], [0], [0], [0, 0, 1, 0], [], []>} : vector<16x8xbf16>, vector<16x8xbf16>, vector<16x16xf32> -> vector<16x16xf32>
    "tpu.trace_stop"() : () -> ()
    %82 = arith.addf %81, %8 : vector<16x16xf32>
    %cst_29 = arith.constant dense<0xFF800000> : vector<16xf32>
    %83 = vector.multi_reduction <maximumf>, %82, %cst_29 [1] : vector<16x16xf32> to vector<16xf32>
    %84 = vector.shape_cast %83 : vector<16xf32> to vector<16x1xf32>
    %85 = vector.broadcast %84 : vector<16x1xf32> to vector<16x16xf32>
    %86 = arith.subf %82, %85 : vector<16x16xf32>
    %87 = math.exp %86 : vector<16x16xf32>
    %cst_30 = arith.constant dense<0.000000e+00> : vector<16xf32>
    %88 = vector.multi_reduction <add>, %87, %cst_30 [1] : vector<16x16xf32> to vector<16xf32>
    %89 = vector.shape_cast %88 : vector<16xf32> to vector<16x1xf32>
    %90 = tpu.reciprocal %89 {approx = true} : vector<16x1xf32> -> vector<16x1xf32>
    %91 = vector.broadcast %90 : vector<16x1xf32> to vector<16x16xf32>
    %92 = arith.mulf %87, %91 : vector<16x16xf32>
    %93 = arith.truncf %92 : vector<16x16xf32> to vector<16x16xbf16>
    %94 = vector.extract_strided_slice %44 {offsets = [0, 16], sizes = [16, 8], strides = [1, 1]} : vector<16x32xbf16> to vector<16x8xbf16>
    %cst_31 = arith.constant dense<0.000000e+00> : vector<16x8xf32>
    %95 = tpu.matmul %93, %94, %cst_31 {dimension_numbers = #tpu.dot_dimension_numbers<[1], [0], [0], [1], [0, 0, 1, 1], [], []>} : vector<16x16xbf16>, vector<16x8xbf16>, vector<16x8xf32> -> vector<16x8xf32>
    %96 = vector.extract_strided_slice %40 {offsets = [0, 24], sizes = [16, 8], strides = [1, 1]} : vector<16x32xbf16> to vector<16x8xbf16>
    %97 = vector.extract_strided_slice %42 {offsets = [0, 24], sizes = [16, 8], strides = [1, 1]} : vector<16x32xbf16> to vector<16x8xbf16>
    "tpu.trace_start"() <{level = 10 : i32, message = "qd,kd->qk"}> : () -> ()
    %cst_32 = arith.constant dense<0.000000e+00> : vector<16x16xf32>
    %98 = tpu.matmul %96, %97, %cst_32 {dimension_numbers = #tpu.dot_dimension_numbers<[1], [1], [0], [0], [0, 0, 1, 0], [], []>} : vector<16x8xbf16>, vector<16x8xbf16>, vector<16x16xf32> -> vector<16x16xf32>
    "tpu.trace_stop"() : () -> ()
    %99 = arith.addf %98, %8 : vector<16x16xf32>
    %cst_33 = arith.constant dense<0xFF800000> : vector<16xf32>
    %100 = vector.multi_reduction <maximumf>, %99, %cst_33 [1] : vector<16x16xf32> to vector<16xf32>
    %101 = vector.shape_cast %100 : vector<16xf32> to vector<16x1xf32>
    %102 = vector.broadcast %101 : vector<16x1xf32> to vector<16x16xf32>
    %103 = arith.subf %99, %102 : vector<16x16xf32>
    %104 = math.exp %103 : vector<16x16xf32>
    %cst_34 = arith.constant dense<0.000000e+00> : vector<16xf32>
    %105 = vector.multi_reduction <add>, %104, %cst_34 [1] : vector<16x16xf32> to vector<16xf32>
    %106 = vector.shape_cast %105 : vector<16xf32> to vector<16x1xf32>
    %107 = tpu.reciprocal %106 {approx = true} : vector<16x1xf32> -> vector<16x1xf32>
    %108 = vector.broadcast %107 : vector<16x1xf32> to vector<16x16xf32>
    %109 = arith.mulf %104, %108 : vector<16x16xf32>
    %110 = arith.truncf %109 : vector<16x16xf32> to vector<16x16xbf16>
    %111 = vector.extract_strided_slice %44 {offsets = [0, 24], sizes = [16, 8], strides = [1, 1]} : vector<16x32xbf16> to vector<16x8xbf16>
    %cst_35 = arith.constant dense<0.000000e+00> : vector<16x8xf32>
    %112 = tpu.matmul %110, %111, %cst_35 {dimension_numbers = #tpu.dot_dimension_numbers<[1], [0], [0], [1], [0, 0, 1, 1], [], []>} : vector<16x16xbf16>, vector<16x8xbf16>, vector<16x8xf32> -> vector<16x8xf32>
    %113 = tpu.concatenate %61, %78, %95, %112 in 1 : vector<16x8xf32>, vector<16x8xf32>, vector<16x8xf32>, vector<16x8xf32> -> vector<16x32xf32>
    %114 = arith.truncf %113 : vector<16x32xf32> to vector<16x32xbf16>
    %cst_36 = arith.constant dense<0.000000e+00> : vector<16x32xf32>
    %115 = tpu.matmul %114, %10, %cst_36 {dimension_numbers = #tpu.dot_dimension_numbers<[1], [0], [0], [1], [0, 0, 1, 1], [], []>} : vector<16x32xbf16>, vector<32x32xbf16>, vector<16x32xf32> -> vector<16x32xf32>
    %116 = vector.broadcast %3 : vector<1x32xf32> to vector<16x32xf32>
    %117 = arith.addf %115, %116 : vector<16x32xf32>
    %118 = arith.addf %0, %117 : vector<16x32xf32>
    %cst_37 = arith.constant dense<0.000000e+00> : vector<16xf32>
    %119 = vector.multi_reduction <add>, %118, %cst_37 [1] : vector<16x32xf32> to vector<16xf32>
    %120 = vector.shape_cast %119 : vector<16xf32> to vector<16x1xf32>
    %cst_38 = arith.constant 3.200000e+01 : f32
    %121 = vector.broadcast %cst_38 : f32 to vector<16x1xf32>
    %122 = arith.divf %120, %121 : vector<16x1xf32>
    %123 = vector.broadcast %122 : vector<16x1xf32> to vector<16x32xf32>
    %124 = arith.subf %118, %123 : vector<16x32xf32>
    %125 = vector.broadcast %122 : vector<16x1xf32> to vector<16x32xf32>
    %126 = arith.subf %118, %125 : vector<16x32xf32>
    %127 = arith.mulf %124, %126 : vector<16x32xf32>
    %cst_39 = arith.constant dense<0.000000e+00> : vector<16xf32>
    %128 = vector.multi_reduction <add>, %127, %cst_39 [1] : vector<16x32xf32> to vector<16xf32>
    %129 = vector.shape_cast %128 : vector<16xf32> to vector<16x1xf32>
    %cst_40 = arith.constant 3.200000e+01 : f32
    %130 = vector.broadcast %cst_40 : f32 to vector<16x1xf32>
    %131 = arith.divf %129, %130 : vector<16x1xf32>
    %132 = vector.broadcast %122 : vector<16x1xf32> to vector<16x32xf32>
    %133 = arith.subf %118, %132 : vector<16x32xf32>
    %cst_41 = arith.constant 9.99999974E-6 : f32
    %134 = vector.broadcast %cst_41 : f32 to vector<16x1xf32>
    %135 = arith.addf %131, %134 : vector<16x1xf32>
    %136 = math.rsqrt %135 : vector<16x1xf32>
    %137 = vector.broadcast %136 : vector<16x1xf32> to vector<16x32xf32>
    %138 = arith.mulf %133, %137 : vector<16x32xf32>
    %139 = vector.broadcast %4 : vector<1x32xf32> to vector<16x32xf32>
    %140 = arith.mulf %138, %139 : vector<16x32xf32>
    %141 = vector.broadcast %5 : vector<1x32xf32> to vector<16x32xf32>
    %142 = arith.addf %140, %141 : vector<16x32xf32>
    %143 = arith.truncf %142 : vector<16x32xf32> to vector<16x32xbf16>
    %cst_42 = arith.constant dense<0.000000e+00> : vector<16x128xf32>
    %144 = tpu.matmul %143, %11, %cst_42 {dimension_numbers = #tpu.dot_dimension_numbers<[1], [0], [0], [1], [0, 0, 1, 1], [], []>} : vector<16x32xbf16>, vector<32x128xbf16>, vector<16x128xf32> -> vector<16x128xf32>
    %145 = vector.broadcast %7 : vector<1x128xf32> to vector<16x128xf32>
    %146 = arith.addf %144, %145 : vector<16x128xf32>
    %cst_43 = arith.constant 0.000000e+00 : f32
    %147 = vector.broadcast %cst_43 : f32 to vector<16x128xf32>
    %148 = arith.maximumf %146, %147 : vector<16x128xf32>
    %149 = arith.truncf %148 : vector<16x128xf32> to vector<16x128xbf16>
    %cst_44 = arith.constant dense<0.000000e+00> : vector<16x32xf32>
    %150 = tpu.matmul %149, %12, %cst_44 {dimension_numbers = #tpu.dot_dimension_numbers<[1], [0], [0], [1], [0, 0, 1, 1], [], []>} : vector<16x128xbf16>, vector<128x32xbf16>, vector<16x32xf32> -> vector<16x32xf32>
    %151 = vector.broadcast %6 : vector<1x32xf32> to vector<16x32xf32>
    %152 = arith.addf %150, %151 : vector<16x32xf32>
    %153 = arith.addf %118, %152 : vector<16x32xf32>
    %c0_45 = arith.constant 0 : index
    %c0_46 = arith.constant 0 : index
    %154 = vector.load %arg3[%c0_45, %c0_46] : memref<16x32xf32, #tpu.memory_space<vmem>>, vector<16x32xf32>
    tpu.vector_store %arg3[%c0_45, %c0_46], %153 {strides = array<i32>} : memref<16x32xf32, #tpu.memory_space<vmem>>, vector<16x32xf32>,
    return
  }
}

</mosaic_0001>

<bundles_post_ra>
// kernel: tpu_custom_call.1
= control target key start
LH: loop header
LB: loop body
LE: loop exit
PB: predicated region body
PF: predicated region fallthrough
CT: control target
= control target key end

     0   :  { %8 = vsyncpa [#allocation3], 0  ;;  %s1515_s0 = inlined_call_operand.hbm [shape: f32[16,32], index: 0, kind: input, shape index: {}]   ;;  %s1516_s1 = inlined_call_operand.hbm [shape: f32[24,128], index: 1, kind: input, shape index: {}]   ;;  %s1517_s2 = inlined_call_operand.hbm [shape: bf16[160,256], index: 2, kind: input, shape index: {}]   ;;  %s1518_s3 = inlined_call_operand.hbm [shape: f32[16,32], index: 3, kind: output, shape index: {}]  }
   0x1   :  { %9 = vsyncpa [#allocation6], 0 }
   0x2   :  { %10 = vsyncpa [#allocation4], 0  ;;  %s1311_s12 = smov [#allocation5]   ;;  %s1312_s14 = smov [#allocation2]  }
   0x3   :  { %s28_s13 = sshll.u32 %s1311_s12, 4  ;;  %s16_s15 = sshll.u32 %s1312_s14, 4  ;;  %s29_s13 = int_to_ptr.vmem [resolvable:$true] %s28_s13  ;;  %s17_s15 = int_to_ptr.vmem [resolvable:$true] %s16_s15 }
   0x4   :  { %s1233_s16 = scalar_lea.vmem %s29_s13, 384  ;;  %p1238_p1 = scmp.lt.s32.totalorder %s29_s13, %s29_s13 }
   0x5   :  { %p1234_p0 = scmp.ne.s32.totalorder %s29_s13, %s1233_s16  ;;  %p1239_p2 = scmp.lt.s32.totalorder %s1233_s16, %s1233_s16 }
   0x7   :  { %p1240_p3 = por %p1239_p2, %p1238_p1 }
   0x9   :  { %p1241_p4 = pnand %p1240_p3, %p1234_p0 }
   0xb   :  { %1244 = shalt.err (!%p1241_p4)
}
   0xc   :  { %s1313_s17 = smov 128   ;;  %s1314_s18 = smov 8  }
   0xd   :  { %34 = dma.hbm_to_vmem [thread:$0]  %s1516_s1, 384, %s29_s13, [#allocation6], %s1313_s17, %s1313_s17, %s1314_s18  }
   0xe   :  { %s1253_s21 = scalar_lea.vmem %s17_s15, 256  ;;  %p1258_p6 = scmp.lt.s32.totalorder %s17_s15, %s17_s15 }
   0xf   :  { %p1254_p5 = scmp.ne.s32.totalorder %s17_s15, %s1253_s21  ;;  %p1259_p7 = scmp.lt.s32.totalorder %s1253_s21, %s1253_s21 }
  0x11   :  { %p1260_p8 = por %p1259_p7, %p1258_p6 }
  0x13   :  { %p1261_p9 = pnand %p1260_p8, %p1254_p5 }
  0x15   :  { %1264 = shalt.err (!%p1261_p9)
}
  0x16   :  { %22 = dma.hbm_to_vmem [thread:$0]  %s1515_s0, 256, %s17_s15, [#allocation3], %s1313_s17, %s1313_s17, %s1314_s18  }
  0x17   :  { %s1315_s24 = smov [#allocation7]  }
  0x18   :  { %s40_s25 = sshll.u32 %s1315_s24, 4  ;;  %s41_s25 = int_to_ptr.vmem [resolvable:$true] %s40_s25 }
  0x19   :  { %s1273_s26 = scalar_lea.vmem %s41_s25, 2560  ;;  %p1278_p11 = scmp.lt.s32.totalorder %s41_s25, %s41_s25 }
  0x1a   :  { %p1274_p10 = scmp.ne.s32.totalorder %s41_s25, %s1273_s26  ;;  %p1279_p12 = scmp.lt.s32.totalorder %s1273_s26, %s1273_s26 }
  0x1c   :  { %p1280_p13 = por %p1279_p12, %p1278_p11 }
  0x1e   :  { %p1281_p0 = pnand %p1280_p13, %p1274_p10 }
  0x20   :  { %1284 = shalt.err (!%p1281_p0)
}
  0x21   :  { %46 = dma.hbm_to_vmem [thread:$0]  %s1517_s2, 2560, %s41_s25, [#allocation6], %s1313_s17, %s1313_s17, %s1314_s18  }
  0x22   :  { %1305 = dma.done.wait [#allocation3], 256  }
  0x23   :  { %1306 = vsyncadd [#allocation3], 4294967040 }
  0x24   :  { %1307 = dma.done.wait [#allocation6], 2944  }
  0x25   :  { %1308 = vsyncadd [#allocation6], 4294964352  ;;  %vm92_vm0 = vcmask 261120   ;;  %v1371_v0 = vld [vmem:[#allocation2] sm:$0xff]  ;;  %v1373_v1 = vld [vmem:[#allocation2 + $0x8] sm:$0xff]  ;;  %v1316_v15 = vmov 0.0  }
  0x26   :  { %v93_v2 = vsel %vm92_vm0, %v1371_v0, 0.0  ;;  %v96_v3 = vsel %vm92_vm0, %v1373_v1, 0.0  ;;  %v1383_v14 = vld [vmem:[#allocation7 + $0x10] ss:$8 sps:$4 sm:$0xff]   ;;  %1044 = vmatprep.subr.bf16.mxu0 %v1316_v15  ;;  %vm1317_vm1 = vmmov 0   ;;  %1064 = vmatprep.subr.bf16.mxu1 %v1316_v15  ;;  %s1318_s0 = smov 88  }
  0x27   :  { %94 = vadd.xlane.f32.xlu0 %v93_v2  ;;  %1048 = vmatprep.mubr.msk.bf16.mxu0 %vm1317_vm1, %v1316_v15  ;;  %v1389_v16 = vld [vmem:[#allocation7] ss:$8 sps:$4 sm:$0xff]   ;;  %s1319_s2 = smov 96   ;;  %s1320_s28 = smov 120   ;;  %vm193_vm2 = vcmask 64512   ;;  %v66_v50 = vld [vmem:[#allocation5 + $0x8] sm:$0xff] }
  0x28   :  { %1045 = vmatpush3.bf16.msra.mxu0 %v1383_v14  ;;  %1066 = vmatprep.mubr.msk.bf16.mxu1 %vm1317_vm1, %v1316_v15  ;;  %v980_v25 = vld [vmem:[#allocation5] ss:$0 sm:$0xff]  ;;  %v981_v29 = vld [vmem:[#allocation5 + $0x1] ss:$0 sm:$0xff]  ;;  %s1321_s29 = smov 112   ;;  %s1322_s30 = smov 80  }
  0x29   :  { %1046 = vmatprep.subr.bf16.mxu0 %v1316_v15  ;;  %s1323_s4 = smov 104   ;;  %s1324_s5 = smov 72   ;;  %vm241_vm3 = vcmask 130048   ;;  %v67_v56 = vld [vmem:[#allocation5 + $0x10] sm:$0xff]  ;;  %vm703_vm4 = vcmask 195584  }
  0x2a   :  { %s1325_s6 = smov 64   ;;  %s1326_s7 = smov 48  }
  0x2b   :  { %97 = vadd.xlane.f32.xlu0 %v96_v3  ;;  %s1327_s8 = smov 40   ;;  %s1328_s9 = smov 56  }
  0x2c   :  { %1047 = vmatpush3.bf16.msra.mxu0 %v1389_v16  ;;  %s1329_s10 = smov 32   ;;  %s1330_s11 = smov 16  }
  0x2d   :  { %1052 = vmatprep.subr.bf16.mxu0 %v1316_v15  ;;  %s1331_s12 = smov 24   ;;  %s1332_s13 = smov [#allocation8]  }
  0x2e   :  { %s967_s14 = sshll.u32 %s1332_s13, 4  ;;  %s968_s14 = int_to_ptr.vmem [resolvable:$true] %s967_s14 }
  0x2f   :  { %s1285_s15 = scalar_lea.vmem %s968_s14, 256  ;;  %p1290_p2 = scmp.lt.s32.totalorder %s968_s14, %s968_s14 }
  0x30   :  { %p1286_p1 = scmp.ne.s32.totalorder %s968_s14, %s1285_s15  ;;  %p1291_p3 = scmp.lt.s32.totalorder %s1285_s15, %s1285_s15 }
  0x32   :  { %p1292_p4 = por %p1291_p3, %p1290_p2 }
  0x34   :  { %p1293_p5 = pnand %p1292_p4, %p1286_p1 }
  0xb0   :  { %v95_v4 = vpop.xlane.xlu0 %94 }
  0xb1   :  { %v100_v5 = vmul.f32 0.03125, %v95_v4 }
  0xb3   :  { %v102_v6 = vsub.f32 %v1371_v0, %v100_v5 }
  0xb4   :  { %v98_v7 = vpop.xlane.xlu0 %97 }
  0xb5   :  { %v101_v8 = vmul.f32 0.03125, %v98_v7  ;;  %v104_v9 = vmul.f32 %v102_v6, %v102_v6 }
  0xb7   :  { %v103_v10 = vsub.f32 %v1373_v1, %v101_v8  ;;  %v106_v11 = vsel %vm92_vm0, %v104_v9, 0.0 }
  0xb8   :  { %107 = vadd.xlane.f32.xlu1 %v106_v11 }
  0xb9   :  { %v105_v12 = vmul.f32 %v103_v10, %v103_v10 }
  0xbb   :  { %v109_v13 = vsel %vm92_vm0, %v105_v12, 0.0 }
  0xbc   :  { %110 = vadd.xlane.f32.xlu1 %v109_v13 }
 0x141   :  { %v108_v17 = vpop.xlane.xlu1 %107 }
 0x142   :  { %v112_v18 = vmul.f32 0.03125, %v108_v17 }
 0x144   :  { %v114_v19 = vadd.f32 1e-05, %v112_v18 }
 0x145   :  { %v111_v20 = vpop.xlane.xlu1 %110 }
 0x146   :  { %1185 = vrsqrt.f32 %v114_v19  ;;  %v113_v21 = vmul.f32 0.03125, %v111_v20 }
 0x148   :  { %v115_v22 = vadd.f32 1e-05, %v113_v21 }
 0x14a   :  { %1187 = vrsqrt.f32 %v115_v22 }
 0x153   :  { %v1186_v23 = vpop.eup %1185 }
 0x154   :  { %v118_v24 = vmul.f32 %v1186_v23, %v102_v6 }
 0x156   :  { %v124_v28 = vmul.f32 %v980_v25, %v118_v24 }
 0x157   :  { %v1188_v26 = vpop.eup %1187 }
 0x158   :  { %v119_v27 = vmul.f32 %v1188_v26, %v103_v10  ;;  %v130_v31 = vadd.f32 %v981_v29, %v124_v28 }
 0x15a   :  { %v125_v30 = vmul.f32 %v980_v25, %v119_v27 }
 0x15c   :  { %v131_v32 = vadd.f32 %v981_v29, %v125_v30 }
 0x15e   :  { %v132_v33 = vpack.c.bf16 %v131_v32, %v130_v31 }
 0x160   :  { %1049 = vmatmul.mubr.msk.bf16.vlgmr.msra.gmra.mxu0 %vm92_vm0, %v132_v33 }
 0x161   :  { %1054 = vmatprep.mubr.msk.bf16.mxu0 %vm1317_vm1, %v1316_v15 }
 0x220   :  { %v182_v34 = vpop.f32.mrf.mxu0 }
 0x222   :  { %v1050_v35 = vpop.f32.mrf.mxu0 }
 0x224   :  { %v185_v36 = vpop.f32.mrf.mxu0 }
 0x225   :  { %v1400_v37 = vpack.c.bf16 %v185_v36, %v182_v34 }
 0x226   :  { %v1051_v38 = vpop.f32.mrf.mxu0 }
 0x227   :  { %314 = vrot.lane.b32.xlu1 %v1400_v37, %s1318_s0  ;;  %191 = vrot.lane.b32.xlu0 %v1400_v37, %s1319_s2 }
 0x22b   :  { %312 = vrot.lane.b32.xlu1 %v1400_v37, %s1320_s28  ;;  %433 = vrot.lane.b32.xlu0 %v1400_v37, %s1321_s29 }
 0x22f   :  { %435 = vrot.lane.b32.xlu1 %v1400_v37, %s1322_s30  ;;  %554 = vrot.lane.b32.xlu0 %v1400_v37, %s1323_s4 }
 0x233   :  { %556 = vrot.lane.b32.xlu1 %v1400_v37, %s1324_s5 }
 0x299   :  { %v315_v39 = vpop.permute.xlu1 %314  ;;  %v192_v40 = vpop.permute.xlu0 %191 }
 0x29a   :  { %v198_v41 = vsel %vm193_vm2, %v192_v40, 0  ;;  %v320_v42 = vsel %vm193_vm2, %v315_v39, 0 }
 0x29b   :  { %1053 = vmatpush3.bf16.xpose.msra.mxu0 %v198_v41  ;;  %1065 = vmatpush3.bf16.xpose.msra.mxu1 %v320_v42 }
 0x29c   :  { %1076 = vmatprep.subr.bf16.mxu1 %v1316_v15  ;;  %1058 = vmatprep.subr.bf16.mxu0 %v1316_v15 }
 0x29d   :  { %v313_v43 = vpop.permute.xlu1 %312  ;;  %v434_v47 = vpop.permute.xlu0 %433 }
 0x2a1   :  { %v436_v44 = vpop.permute.xlu1 %435  ;;  %v555_v49 = vpop.permute.xlu0 %554 }
 0x2a2   :  { %v441_v45 = vsel %vm193_vm2, %v436_v44, 0  ;;  %1055 = vmatmul.mubr.msk.bf16.vlgmr.msra.gmra.mxu0 %vm193_vm2, %v1400_v37  ;;  %1067 = vmatmul.mubr.msk.bf16.vlgmr.msra.gmra.mxu1 %vm193_vm2, %v313_v43 }
 0x2a3   :  { %1077 = vmatpush3.bf16.xpose.msra.mxu1 %v441_v45  ;;  %1078 = vmatprep.mubr.msk.bf16.mxu1 %vm1317_vm1, %v1316_v15 }
 0x2a4   :  { %1088 = vmatprep.subr.bf16.mxu1 %v1316_v15  ;;  %1060 = vmatprep.mubr.msk.bf16.mxu0 %vm1317_vm1, %v1316_v15 }
 0x2a5   :  { %v557_v46 = vpop.permute.xlu1 %556 }
 0x2a6   :  { %v562_v48 = vsel %vm193_vm2, %v557_v46, 0 }
 0x2aa   :  { %1079 = vmatmul.mubr.msk.bf16.vlgmr.msra.gmra.mxu1 %vm193_vm2, %v434_v47 }
 0x2ab   :  { %1089 = vmatpush3.bf16.xpose.msra.mxu1 %v562_v48  ;;  %1090 = vmatprep.mubr.msk.bf16.mxu1 %vm1317_vm1, %v1316_v15 }
 0x2ac   :  { %1100 = vmatprep.subr.bf16.mxu1 %v1316_v15 }
 0x2b2   :  { %1091 = vmatmul.mubr.msk.bf16.vlgmr.msra.gmra.mxu1 %vm193_vm2, %v555_v49 }
 0x2b3   :  { %1104 = vmatprep.mubr.msk.bf16.mxu1 %vm1317_vm1, %v1316_v15 }
 0x362   :  { %v234_v51 = vpop.f32.mrf.mxu0  ;;  %v356_v52 = vpop.f32.mrf.mxu1 }
 0x363   :  { %v235_v53 = vadd.f32 %v234_v51, %v66_v50  ;;  %v357_v63 = vadd.f32 %v356_v52, %v66_v50 }
 0x364   :  { %v1056_v54 = vpop.f32.mrf.mxu0  ;;  %v1068_v55 = vpop.f32.mrf.mxu1 }
 0x365   :  { %v242_v57 = vsel %vm241_vm3, %v235_v53, -inf  ;;  %v363_v8 = vsel %vm241_vm3, %v357_v63, -inf }
 0x366   :  { %v359_v58 = vpop.f32.mrf.mxu1  ;;  %243 = vmax.xlane.f32.xlu1 %v242_v57  ;;  %v237_v59 = vpop.f32.mrf.mxu0 }
 0x367   :  { %v238_v60 = vadd.f32 %v237_v59, %v67_v56  ;;  %v360_v6 = vadd.f32 %v359_v58, %v67_v56 }
 0x368   :  { %v1057_v61 = vpop.f32.mrf.mxu0  ;;  %v1069_v62 = vpop.f32.mrf.mxu1 }
 0x369   :  { %v245_v2 = vsel %vm241_vm3, %v238_v60, -inf  ;;  %v366_v12 = vsel %vm241_vm3, %v360_v6, -inf }
 0x36a   :  { %v477_v3 = vpop.f32.mrf.mxu1  ;;  %246 = vmax.xlane.f32.xlu0 %v245_v2 }
 0x36b   :  { %v478_v4 = vadd.f32 %v477_v3, %v66_v50 }
 0x36c   :  { %v1080_v5 = vpop.f32.mrf.mxu1 }
 0x36d   :  { %v484_v7 = vsel %vm241_vm3, %v478_v4, -inf }
 0x36e   :  { %v480_v9 = vpop.f32.mrf.mxu1  ;;  %485 = vmax.xlane.f32.xlu1 %v484_v7  ;;  %364 = vmax.xlane.f32.xlu0 %v363_v8 }
 0x36f   :  { %v481_v11 = vadd.f32 %v480_v9, %v67_v56 }
 0x370   :  { %v1081_v10 = vpop.f32.mrf.mxu1 }
 0x371   :  { %v487_v20 = vsel %vm241_vm3, %v481_v11, -inf }
 0x372   :  { %v598_v13 = vpop.f32.mrf.mxu1  ;;  %367 = vmax.xlane.f32.xlu0 %v366_v12 }
 0x373   :  { %v599_v17 = vadd.f32 %v598_v13, %v66_v50 }
 0x374   :  { %v1092_v18 = vpop.f32.mrf.mxu1 }
 0x375   :  { %v605_v19 = vsel %vm241_vm3, %v599_v17, -inf }
 0x376   :  { %v601_v21 = vpop.f32.mrf.mxu1  ;;  %606 = vmax.xlane.f32.xlu1 %v605_v19  ;;  %488 = vmax.xlane.f32.xlu0 %v487_v20 }
 0x377   :  { %v602_v22 = vadd.f32 %v601_v21, %v67_v56 }
 0x378   :  { %v1093_v23 = vpop.f32.mrf.mxu1 }
 0x379   :  { %v608_v24 = vsel %vm241_vm3, %v602_v22, -inf }
 0x37a   :  { %609 = vmax.xlane.f32.xlu0 %v608_v24 }
 0x387   :  { %265 = vrot.lane.b32.xlu1 %v1400_v37, %s1325_s6 }
 0x3ef   :  { %v244_v25 = vpop.xlane.xlu1 %243 }
 0x3f0   :  { %v248_v26 = vsub.f32 %v235_v53, %v244_v25 }
 0x3f2   :  { %v250_v27 = vmul.f32 1.442695, %v248_v26 }
 0x3f3   :  { %v247_v28 = vpop.xlane.xlu0 %246 }
 0x3f4   :  { %1189 = vpow2.f32 %v250_v27  ;;  %v249_v29 = vsub.f32 %v238_v60, %v247_v28 }
 0x3f6   :  { %v252_v30 = vmul.f32 1.442695, %v249_v29 }
 0x3f7   :  { %v486_v31 = vpop.xlane.xlu1 %485  ;;  %v365_v32 = vpop.xlane.xlu0 %364 }
 0x3f8   :  { %1191 = vpow2.f32 %v252_v30  ;;  %v490_v33 = vsub.f32 %v478_v4, %v486_v31  ;;  %v369_v34 = vsub.f32 %v357_v63, %v365_v32 }
 0x3fa   :  { %v371_v35 = vmul.f32 1.442695, %v369_v34  ;;  %v492_v36 = vmul.f32 1.442695, %v490_v33 }
 0x3fb   :  { %v368_v38 = vpop.xlane.xlu0 %367 }
 0x3fc   :  { %v370_v39 = vsub.f32 %v360_v6, %v368_v38  ;;  %1193 = vpow2.f32 %v371_v35 }
 0x3fd   :  { %1195 = vpow2.f32 %v492_v36 }
 0x3fe   :  { %v373_v40 = vmul.f32 1.442695, %v370_v39 }
 0x3ff   :  { %v607_v41 = vpop.xlane.xlu1 %606  ;;  %v489_v42 = vpop.xlane.xlu0 %488 }
 0x400   :  { %1197 = vpow2.f32 %v373_v40  ;;  %v611_v43 = vsub.f32 %v599_v17, %v607_v41  ;;  %v491_v44 = vsub.f32 %v481_v11, %v489_v42 }
 0x401   :  { %v1190_v45 = vpop.eup %1189 }
 0x402   :  { %v613_v46 = vmul.f32 1.442695, %v611_v43  ;;  %v494_v47 = vmul.f32 1.442695, %v491_v44  ;;  %v254_v48 = vsel %vm241_vm3, %v1190_v45, 0.0 }
 0x403   :  { %255 = vadd.xlane.f32.xlu1 %v254_v48  ;;  %v266_v49 = vpop.permute.xlu1 %265  ;;  %v610_v50 = vpop.xlane.xlu0 %609 }
 0x404   :  { %1199 = vpow2.f32 %v613_v46  ;;  %v612_v51 = vsub.f32 %v602_v22, %v610_v50  ;;  %1059 = vmatpush3.bf16.msra.mxu0 %v266_v49 }
 0x405   :  { %v1192_v52 = vpop.eup %1191  ;;  %1201 = vpow2.f32 %v494_v47  ;;  %1070 = vmatprep.subr.bf16.mxu0 %v1316_v15 }
 0x406   :  { %v615_v53 = vmul.f32 1.442695, %v612_v51  ;;  %v257_v54 = vsel %vm241_vm3, %v1192_v52, 0.0 }
 0x407   :  { %258 = vadd.xlane.f32.xlu0 %v257_v54 }
 0x408   :  { %1203 = vpow2.f32 %v615_v53 }
 0x409   :  { %v1194_v55 = vpop.eup %1193 }
 0x40a   :  { %v375_v56 = vsel %vm241_vm3, %v1194_v55, 0.0  ;;  %v1196_v57 = vpop.eup %1195 }
 0x40b   :  { %376 = vadd.xlane.f32.xlu1 %v375_v56  ;;  %v496_v60 = vsel %vm241_vm3, %v1196_v57, 0.0 }
 0x40d   :  { %v1198_v58 = vpop.eup %1197 }
 0x40e   :  { %v378_v59 = vsel %vm241_vm3, %v1198_v58, 0.0 }
 0x40f   :  { %379 = vadd.xlane.f32.xlu0 %v378_v59  ;;  %497 = vadd.xlane.f32.xlu1 %v496_v60 }
 0x411   :  { %v1445_v61 = vpop.eup %1199 }
 0x412   :  { %v1202_v62 = vpop.eup %1201  ;;  %v617_v63 = vsel %vm241_vm3, %v1445_v61, 0.0 }
 0x413   :  { %v499_v2 = vsel %vm241_vm3, %v1202_v62, 0.0  ;;  %618 = vadd.xlane.f32.xlu1 %v617_v63 }
 0x414   :  { %500 = vadd.xlane.f32.xlu0 %v499_v2 }
 0x415   :  { %v1204_v3 = vpop.eup %1203 }
 0x416   :  { %v620_v4 = vsel %vm241_vm3, %v1204_v3, 0.0 }
 0x418   :  { %621 = vadd.xlane.f32.xlu0 %v620_v4 }
 0x424   :  { %507 = vrot.lane.b32.xlu1 %v1400_v37, %s1326_s7 }
 0x428   :  { %628 = vrot.lane.b32.xlu1 %v1400_v37, %s1327_s8 }
 0x42c   :  { %713 = vrot.lane.b32.xlu1 %v1383_v14, %s1329_s10 }
 0x42e   :  { %386 = vrot.lane.b32.xlu0 %v1400_v37, %s1328_s9 }
 0x48c   :  { %v256_v5 = vpop.xlane.xlu1 %255 }
 0x48d   :  { %1205 = vrcp.f32 %v256_v5 }
 0x490   :  { %v259_v6 = vpop.xlane.xlu0 %258 }
 0x491   :  { %1207 = vrcp.f32 %v259_v6 }
 0x494   :  { %v377_v7 = vpop.xlane.xlu1 %376 }
 0x495   :  { %1209 = vrcp.f32 %v377_v7 }
 0x498   :  { %v380_v8 = vpop.xlane.xlu0 %379  ;;  %v498_v9 = vpop.xlane.xlu1 %497 }
 0x499   :  { %1211 = vrcp.f32 %v380_v8 }
 0x49a   :  { %v1206_v10 = vpop.eup %1205  ;;  %1213 = vrcp.f32 %v498_v9 }
 0x49b   :  { %v262_v13 = vmul.f32 %v1206_v10, %v1190_v45 }
 0x49c   :  { %v619_v20 = vpop.xlane.xlu1 %618 }
 0x49d   :  { %v501_v11 = vpop.xlane.xlu0 %500 }
 0x49e   :  { %v1208_v12 = vpop.eup %1207  ;;  %1215 = vrcp.f32 %v501_v11 }
 0x49f   :  { %v263_v17 = vmul.f32 %v1208_v12, %v1192_v52  ;;  %v993_v12 = vld [vmem:[#allocation5 + $0x2] ss:$0 sm:$0xff] }
 0x4a0   :  { %v508_v27 = vpop.permute.xlu1 %507 }
 0x4a1   :  { %v622_v18 = vpop.xlane.xlu0 %621  ;;  %v264_v19 = vpack.c.bf16 %v263_v17, %v262_v13 }
 0x4a2   :  { %v1210_v37 = vpop.eup %1209  ;;  %1217 = vrcp.f32 %v622_v18 }
 0x4a3   :  { %1061 = vmatmul.mubr.msk.bf16.vlgmr.msra.gmra.mxu0 %vm241_vm3, %v264_v19  ;;  %1219 = vrcp.f32 %v619_v20  ;;  %v383_v23 = vmul.f32 %v1210_v37, %v1194_v55 }
 0x4a4   :  { %1072 = vmatprep.mubr.msk.bf16.mxu0 %vm1317_vm1, %v1316_v15  ;;  %v629_v33 = vpop.permute.xlu1 %628 }
 0x4a5   :  { %v387_v21 = vpop.permute.xlu0 %386 }
 0x4a6   :  { %v1212_v22 = vpop.eup %1211  ;;  %1071 = vmatpush3.bf16.msra.mxu0 %v387_v21 }
 0x4a7   :  { %1082 = vmatprep.subr.bf16.mxu0 %v1316_v15  ;;  %v384_v24 = vmul.f32 %v1212_v22, %v1198_v58  ;;  %v1214_v26 = vpop.eup %1213 }
 0x4a8   :  { %v504_v30 = vmul.f32 %v1214_v26, %v1196_v57  ;;  %v714_v42 = vpop.permute.xlu1 %713 }
 0x4a9   :  { %v385_v25 = vpack.c.bf16 %v384_v24, %v383_v23  ;;  %1101 = vmatpush3.bf16.msra.mxu1 %v714_v42 }
 0x4aa   :  { %1102 = vmatprep.subr.bf16.mxu1 %v1316_v15 }
 0x4ab   :  { %1073 = vmatmul.mubr.msk.bf16.vlgmr.msra.gmra.mxu0 %vm241_vm3, %v385_v25  ;;  %v1216_v28 = vpop.eup %1215 }
 0x4ac   :  { %1083 = vmatpush3.bf16.msra.mxu0 %v508_v27  ;;  %1084 = vmatprep.mubr.msk.bf16.mxu0 %vm1317_vm1, %v1316_v15  ;;  %v505_v29 = vmul.f32 %v1216_v28, %v1202_v62 }
 0x4ad   :  { %1094 = vmatprep.subr.bf16.mxu0 %v1316_v15 }
 0x4ae   :  { %v506_v31 = vpack.c.bf16 %v505_v29, %v504_v30 }
 0x4af   :  { %v1218_v32 = vpop.eup %1217 }
 0x4b0   :  { %v1220_v34 = vpop.eup %1219  ;;  %v626_v35 = vmul.f32 %v1218_v32, %v1204_v3 }
 0x4b1   :  { %v625_v36 = vmul.f32 %v1220_v34, %v1445_v61  ;;  %v1176_v34 = vld [vmem:[#allocation7 + $0x4] ss:$8 sps:$4 sm:$0xff]  }
 0x4b3   :  { %1085 = vmatmul.mubr.msk.bf16.vlgmr.msra.gmra.mxu0 %vm241_vm3, %v506_v31  ;;  %v627_v38 = vpack.c.bf16 %v626_v35, %v625_v36  ;;  %v1177_v35 = vld [vmem:[#allocation7 + $0x90] ss:$8 sps:$4 sm:$0xff]   ;;  %v1178_v36 = vld [vmem:[#allocation7 + $0x80] ss:$8 sps:$4 sm:$0xff]  }
 0x4b4   :  { %1095 = vmatpush3.bf16.msra.mxu0 %v629_v33  ;;  %1096 = vmatprep.mubr.msk.bf16.mxu0 %vm1317_vm1, %v1316_v15  ;;  %v1175_v33 = vld [vmem:[#allocation7 + $0x14] ss:$8 sps:$4 sm:$0xff]  }
 0x4b5   :  { %1108 = vmatprep.subr.bf16.mxu0 %v1316_v15 }
 0x4bb   :  { %1097 = vmatmul.mubr.msk.bf16.vlgmr.msra.gmra.mxu0 %vm241_vm3, %v627_v38  ;;  %v1179_v38 = vld [vmem:[#allocation7 + $0x70] ss:$8 sps:$4 sm:$0xff]  }
 0x4bc   :  { %1112 = vmatprep.mubr.msk.bf16.mxu0 %vm1317_vm1, %v1316_v15  ;;  %1109 = vmatpush3.bf16.msra.mxu0 %v1175_v33 }
 0x4bd   :  { %1110 = vmatprep.subr.bf16.mxu0 %v1316_v15 }
 0x4c0   :  { %1111 = vmatpush3.bf16.msra.mxu0 %v1176_v34 }
 0x563   :  { %v305_v39 = vpop.f32.mrf.mxu0 }
 0x565   :  { %v1062_v40 = vpop.f32.mrf.mxu0 }
 0x566   :  { %v1181_v40 = vld [vmem:[#allocation7 + $0x50] ss:$8 sps:$4 sm:$0xff]  }
 0x567   :  { %v308_v41 = vpop.f32.mrf.mxu0 }
 0x569   :  { %v1063_v43 = vpop.f32.mrf.mxu0 }
 0x56b   :  { %v426_v44 = vpop.f32.mrf.mxu0 }
 0x56d   :  { %v1074_v45 = vpop.f32.mrf.mxu0 }
 0x56f   :  { %v429_v46 = vpop.f32.mrf.mxu0 }
 0x570   :  { %v1158_v47 = vpack.i.bf16 %v429_v46, %v426_v44 }
 0x571   :  { %v1075_v48 = vpop.f32.mrf.mxu0 }
 0x572   :  { %1159 = vrot.lane.b32.xlu0 %v1158_v47, %s1314_s18 }
 0x573   :  { %v547_v49 = vpop.f32.mrf.mxu0 }
 0x575   :  { %v1086_v50 = vpop.f32.mrf.mxu0 }
 0x577   :  { %v550_v51 = vpop.f32.mrf.mxu0 }
 0x578   :  { %v1163_v52 = vpack.i.bf16 %v550_v51, %v547_v49  ;;  %v995_v49 = vld [vmem:[#allocation5 + $0x3] ss:$0 sm:$0xff] }
 0x579   :  { %v1087_v14 = vpop.f32.mrf.mxu0 }
 0x57a   :  { %1164 = vrot.lane.b32.xlu1 %v1163_v52, %s1330_s11  ;;  %v996_v14 = vld [vmem:[#allocation5 + $0x4] ss:$0 sm:$0xff] }
 0x57b   :  { %v668_v53 = vpop.f32.mrf.mxu0 }
 0x57d   :  { %v1098_v54 = vpop.f32.mrf.mxu0 }
 0x57e   :  { %711 = vrot.lane.b32.xlu1 %v1389_v16, %s1329_s10 }
 0x57f   :  { %v671_v55 = vpop.f32.mrf.mxu0 }
 0x580   :  { %v1168_v56 = vpack.i.bf16 %v671_v55, %v668_v53 }
 0x581   :  { %v1099_v57 = vpop.f32.mrf.mxu0 }
 0x582   :  { %1169 = vrot.lane.b32.xlu0 %v1168_v56, %s1331_s12  ;;  %v1182_v57 = vld [vmem:[#allocation7 + $0x40] ss:$8 sps:$4 sm:$0xff]  }
 0x5e4   :  { %v1160_v59 = vpop.permute.xlu0 %1159 }
 0x5e5   :  { %v1162_v61 = vunpack.i.h.bf16 %v1160_v59  ;;  %v1161_v62 = vunpack.i.l.bf16 %v1160_v59  ;;  %v1184_v59 = vld [vmem:[#allocation7 + $0x20] ss:$8 sps:$4 sm:$0xff]  }
 0x5e7   :  { %v700_v4 = vsel %vm193_vm2, %v308_v41, %v1162_v61  ;;  %v699_v16 = vsel %vm193_vm2, %v305_v39, %v1161_v62  ;;  %v1180_v39 = vld [vmem:[#allocation7 + $0x60] ss:$8 sps:$4 sm:$0xff]  }
 0x5ec   :  { %v1165_v58 = vpop.permute.xlu1 %1164 }
 0x5ed   :  { %v1167_v63 = vunpack.i.h.bf16 %v1165_v58  ;;  %v1166_v2 = vunpack.i.l.bf16 %v1165_v58  ;;  %v1183_v58 = vld [vmem:[#allocation7 + $0x30] ss:$8 sps:$4 sm:$0xff]  }
 0x5ef   :  { %v702_v7 = vsel %vm241_vm3, %v700_v4, %v1167_v63  ;;  %v701_v8 = vsel %vm241_vm3, %v699_v16, %v1166_v2 }
 0x5f0   :  { %v712_v60 = vpop.permute.xlu1 %711 }
 0x5f1   :  { %1103 = vmatpush3.bf16.msra.mxu1 %v712_v60  ;;  %v997_v60 = vld [vmem:[#allocation5 + $0x6] ss:$0 sm:$0xff] }
 0x5f2   :  { %1116 = vmatprep.subr.bf16.mxu1 %v1316_v15 }
 0x5f4   :  { %v1170_v3 = vpop.permute.xlu0 %1169 }
 0x5f5   :  { %v1172_v5 = vunpack.i.h.bf16 %v1170_v3  ;;  %v1171_v6 = vunpack.i.l.bf16 %v1170_v3 }
 0x5f7   :  { %v705_v9 = vsel %vm703_vm4, %v702_v7, %v1172_v5  ;;  %v704_v10 = vsel %vm703_vm4, %v701_v8, %v1171_v6  ;;  %v1001_v7 = vld [vmem:[#allocation5 + $0x5] ss:$0 sm:$0xff] }
 0x5f8   :  { %v706_v11 = vpack.c.bf16 %v705_v9, %v704_v10 }
 0x5fa   :  { %1105 = vmatmul.mubr.msk.bf16.vlgmr.msra.gmra.mxu1 %vm92_vm0, %v706_v11 }
 0x5fb   :  { %1132 = vmatprep.mubr.msk.bf16.mxu1 %vm1317_vm1, %v1316_v15  ;;  %1117 = vmatpush3.bf16.msra.mxu1 %v1177_v35 }
 0x5fc   :  { %1118 = vmatprep.subr.bf16.mxu1 %v1316_v15 }
 0x5ff   :  { %1119 = vmatpush3.bf16.msra.mxu1 %v1178_v36 }
 0x600   :  { %1120 = vmatprep.subr.bf16.mxu1 %v1316_v15 }
 0x603   :  { %1121 = vmatpush3.bf16.msra.mxu1 %v1179_v38 }
 0x604   :  { %1122 = vmatprep.subr.bf16.mxu1 %v1316_v15 }
 0x607   :  { %1123 = vmatpush3.bf16.msra.mxu1 %v1180_v39 }
 0x608   :  { %1124 = vmatprep.subr.bf16.mxu1 %v1316_v15 }
 0x60b   :  { %1125 = vmatpush3.bf16.msra.mxu1 %v1181_v40 }
 0x60c   :  { %1126 = vmatprep.subr.bf16.mxu1 %v1316_v15 }
 0x60f   :  { %1127 = vmatpush3.bf16.msra.mxu1 %v1182_v57 }
 0x610   :  { %1128 = vmatprep.subr.bf16.mxu1 %v1316_v15 }
 0x613   :  { %1129 = vmatpush3.bf16.msra.mxu1 %v1183_v58 }
 0x614   :  { %1130 = vmatprep.subr.bf16.mxu1 %v1316_v15 }
 0x617   :  { %1131 = vmatpush3.bf16.msra.mxu1 %v1184_v59 }
 0x6ba   :  { %v754_v13 = vpop.f32.mrf.mxu1 }
 0x6bb   :  { %v755_v17 = vadd.f32 %v993_v12, %v754_v13 }
 0x6bc   :  { %v1106_v18 = vpop.f32.mrf.mxu1 }
 0x6bd   :  { %v1483_v19 = vadd.f32 %v755_v17, %v1371_v0 }
 0x6be   :  { %v757_v37 = vpop.f32.mrf.mxu1 }
 0x6bf   :  { %v758_v20 = vadd.f32 %v993_v12, %v757_v37  ;;  %v763_v21 = vsel %vm92_vm0, %v1483_v19, 0.0 }
 0x6c0   :  { %764 = vadd.xlane.f32.xlu0 %v763_v21  ;;  %v1107_v22 = vpop.f32.mrf.mxu1 }
 0x6c1   :  { %v1488_v23 = vadd.f32 %v758_v20, %v1373_v1 }
 0x6c3   :  { %v766_v24 = vsel %vm92_vm0, %v1488_v23, 0.0 }
 0x6c4   :  { %767 = vadd.xlane.f32.xlu1 %v766_v24 }
 0x749   :  { %v765_v25 = vpop.xlane.xlu0 %764 }
 0x74a   :  { %v769_v26 = vmul.f32 0.03125, %v765_v25 }
 0x74c   :  { %v771_v27 = vsub.f32 %v1483_v19, %v769_v26 }
 0x74d   :  { %v768_v0 = vpop.xlane.xlu1 %767 }
 0x74e   :  { %v770_v28 = vmul.f32 0.03125, %v768_v0  ;;  %v773_v29 = vmul.f32 %v771_v27, %v771_v27 }
 0x750   :  { %v772_v30 = vsub.f32 %v1488_v23, %v770_v28  ;;  %v775_v31 = vsel %vm92_vm0, %v773_v29, 0.0 }
 0x751   :  { %776 = vadd.xlane.f32.xlu0 %v775_v31 }
 0x752   :  { %v774_v32 = vmul.f32 %v772_v30, %v772_v30 }
 0x754   :  { %v778_v1 = vsel %vm92_vm0, %v774_v32, 0.0 }
 0x755   :  { %779 = vadd.xlane.f32.xlu0 %v778_v1 }
 0x7da   :  { %v777_v41 = vpop.xlane.xlu0 %776 }
 0x7db   :  { %v781_v42 = vmul.f32 0.03125, %v777_v41 }
 0x7dd   :  { %v783_v43 = vadd.f32 1e-05, %v781_v42 }
 0x7de   :  { %v780_v44 = vpop.xlane.xlu0 %779 }
 0x7df   :  { %1221 = vrsqrt.f32 %v783_v43  ;;  %v782_v45 = vmul.f32 0.03125, %v780_v44 }
 0x7e1   :  { %v784_v46 = vadd.f32 1e-05, %v782_v45 }
 0x7e3   :  { %1223 = vrsqrt.f32 %v784_v46 }
 0x7ec   :  { %v1222_v47 = vpop.eup %1221 }
 0x7ed   :  { %v787_v48 = vmul.f32 %v1222_v47, %v771_v27 }
 0x7ef   :  { %v793_v52 = vmul.f32 %v995_v49, %v787_v48 }
 0x7f0   :  { %v1224_v50 = vpop.eup %1223 }
 0x7f1   :  { %v788_v51 = vmul.f32 %v1224_v50, %v772_v30  ;;  %v799_v54 = vadd.f32 %v996_v14, %v793_v52 }
 0x7f3   :  { %v794_v53 = vmul.f32 %v995_v49, %v788_v51 }
 0x7f5   :  { %v800_v55 = vadd.f32 %v996_v14, %v794_v53 }
 0x7f7   :  { %v801_v56 = vpack.c.bf16 %v800_v55, %v799_v54 }
 0x7f9   :  { %1113 = vmatmul.mubr.msk.bf16.vlgmr.msra.gmra.mxu0 %vm92_vm0, %v801_v56 }
 0x8b9   :  { %v855_v61 = vpop.f32.mrf.mxu0 }
 0x8ba   :  { %v856_v63 = vadd.f32 %v997_v60, %v855_v61 }
 0x8bb   :  { %v1114_v62 = vpop.f32.mrf.mxu0 }
 0x8bc   :  { %v862_v16 = vmax.f32 %v856_v63, 0.0 }
 0x8bd   :  { %v858_v2 = vpop.f32.mrf.mxu0 }
 0x8be   :  { %v859_v3 = vadd.f32 %v997_v60, %v858_v2 }
 0x8bf   :  { %v1115_v4 = vpop.f32.mrf.mxu0 }
 0x8c0   :  { %v863_v5 = vmax.f32 %v859_v3, 0.0 }
 0x8c2   :  { %v864_v6 = vpack.c.bf16 %v863_v5, %v862_v16 }
 0x8c4   :  { %1133 = vmatmul.mubr.bf16.vlgmr.msra.gmra.mxu1 %v864_v6 }
 0x984   :  { %v951_v8 = vpop.f32.mrf.mxu1 }
 0x985   :  { %v952_v9 = vadd.f32 %v1001_v7, %v951_v8 }
 0x986   :  { %v1134_v10 = vpop.f32.mrf.mxu1 }
 0x987   :  { %v958_v11 = vadd.f32 %v952_v9, %v1483_v19 }
 0x988   :  { %v954_v15 = vpop.f32.mrf.mxu1 }
 0x989   :  { %960 = vst.msk [vmem:[#allocation8] sm:$0xff] %vm92_vm0, %v958_v11  ;;  %v955_v12 = vadd.f32 %v1001_v7, %v954_v15 }
 0x98a   :  { %v1135_v13 = vpop.f32.mrf.mxu1 }
 0x98b   :  { %v959_v17 = vadd.f32 %v955_v12, %v1488_v23 }
 0x98d   :  { %961 = vst.msk [vmem:[#allocation8 + $0x8] sm:$0xff] %vm92_vm0, %v959_v17 }
 0x98e   :  { %1296 = shalt.err (!%p1293_p5)
}
 0x98f   :  { %973 = dma.vmem_to_hbm [thread:$0]  %s968_s14, 256, %s1518_s3, [#allocation4], %s1313_s17, %s1313_s17, %s1314_s18  }
 0x990   :  { %1309 = dma.done.wait [#allocation4], 256  }
 0x991   :  { %1310 = vsyncadd [#allocation4], 4294967040 }
 0x992   :  { %977 = vsyncpa [#allocation3], 1 }
 0x993   :  { %978 = vsyncpa [#allocation6], 1 }
 0x994   :  { %979 = vsyncpa [#allocation4], 1 }

</bundles_post_ra>
